<compile_context>
chip_gen: v7x
topology: tpu7x:2x2x1
jax: 0.10.0
libtpu: 0.0.40
codegen_flags: <defaults>
</compile_context>

<pallas_src>
import math
import functools

import jax
import jax.numpy as jnp
from jax.experimental import pallas as pl
from jax.experimental.pallas import tpu as pltpu


# ---------------------------------------------------------------------------
# Parameter setup (mirrors PositionalEncoding.__init__, deterministic)
# ---------------------------------------------------------------------------
def make_positional_encoding(d_model, max_len=64, dtype=jnp.float32):
    position = jnp.arange(max_len, dtype=jnp.float32)[:, None]            # [max_len, 1]
    div_term = jnp.exp(
        jnp.arange(0, d_model, 2, dtype=jnp.float32) * (-math.log(10000.0) / d_model)
    )                                                                      # [d_model/2]
    pe = jnp.zeros((max_len, d_model), dtype=jnp.float32)
    pe = pe.at[:, 0::2].set(jnp.sin(position * div_term))
    pe = pe.at[:, 1::2].set(jnp.cos(position * div_term))
    return pe.astype(dtype)                                                # [max_len, d_model]


# ---------------------------------------------------------------------------
# Kernels
# ---------------------------------------------------------------------------
def _pe_rows(pe_ref, tr, g):
    """Expand the (G, TC) PE tile to cover TR rows (row r uses pe[r % G])."""
    pe = pe_ref[...]
    if g == 1 or tr == g:
        return pe                       # (1,TC) broadcasts; (G,TC) matches exactly
    return jnp.tile(pe, (tr // g, 1))   # TR is always a multiple of G (see blocks)


def _pe_add_kernel(x_ref, pe_ref, o_ref, *, tr, g):
    # Add in f32 (preserves PE precision for bf16 x), cast on store.
    o_ref[...] = (x_ref[...].astype(jnp.float32) + _pe_rows(pe_ref, tr, g)).astype(o_ref.dtype)


def _pe_add_dropout_kernel(x_ref, pe_ref, bits_ref, o_ref, *, tr, g, threshold, scale):
    # Inverted dropout: keep with prob 1-p, scale kept values by 1/(1-p).
    # Integer-threshold compare on raw uint32 bits: P(bits >= threshold) = 1-p.
    y = x_ref[...].astype(jnp.float32) + _pe_rows(pe_ref, tr, g)
    keep = bits_ref[...] >= jnp.uint32(threshold)
    o_ref[...] = jnp.where(keep, y * jnp.float32(scale), 0.0).astype(o_ref.dtype)


# ---------------------------------------------------------------------------
# Layout / block-size selection
# ---------------------------------------------------------------------------
def _tpu_budgets():
    """(per-block byte budget, vmem_limit_bytes) by TPU generation."""
    block_budget, vmem_limit = 4 << 20, 32 << 20        # v7x / unknown / CPU: conservative
    try:
        dev = jax.devices()[0]
        if dev.platform == "tpu":
            kind = str(getattr(dev, "device_kind", "")).lower()
            if ("v5" in kind) or ("v6" in kind):        # 128 MiB physical VMEM
                block_budget, vmem_limit = 12 << 20, 64 << 20
    except Exception:
        pass
    return block_budget, vmem_limit


def _choose_fold(B, S, D):
    """Fold factor G: reshape [B,S,D] -> [B*G, (S/G)*D] when B < 8 so vregs
    (8 sublanes) are better utilized; keep the lane dim a multiple of 128."""
    if B >= 8:
        return 1
    best = 1
    for g in (2, 4, 8):                 # g | 8, so any multiple-of-8 TR is a multiple of g
        if S % g != 0:
            continue
        cols = (S // g) * D
        if cols >= 128 and cols % 128 == 0:
            best = g
            if B * g >= 8:
                break
    return best


def _choose_blocks(n_rows, n_cols, itemsize, budget):
    """Pick (TR, TC) for a (n_rows, n_cols) array.  TR is a multiple of the
    sublane packing (hence of G) or the full row count; TC is a multiple of
    128 or the full column count."""
    sub = {1: 32, 2: 16, 4: 8}.get(itemsize, 8)
    total = n_rows * n_cols * itemsize
    if total <= budget:
        # Mid-size tensors: split rows once so v7x's two TensorCores both get
        # work (free on v5e/v6e, where the grid is just a sequential loop).
        if total > (1 << 20) and n_rows >= 2 * sub:
            tr = ((n_rows + 1) // 2 + sub - 1) // sub * sub
            if tr < n_rows:
                return int(tr), n_cols
        return n_rows, n_cols
    row_bytes = n_cols * itemsize
    if sub * row_bytes <= budget:
        tr = max(sub, (budget // row_bytes) // sub * sub)
        return int(min(tr, n_rows)), n_cols               # row-tiled, lane-dense cols
    # Very wide rows: column-tiled fallback.  Divide the budget by 4 to leave
    # headroom for the 8-sublane-padded, double-buffered PE / dropout-bit tiles.
    tc = max(128, (budget // (4 * sub * itemsize)) // 128 * 128)
    return int(min(sub, n_rows)), int(min(tc, n_cols))


# ---------------------------------------------------------------------------
# Wrapper
# ---------------------------------------------------------------------------
def positional_encoding_forward(x, pe, *, dropout_p=0.1, training=False, seed=0):
    """x: [B, S, D]; pe: [max_len, D] table.  Returns dropout(x + pe[:S])."""
    B, S, D = x.shape
    itemsize = jnp.dtype(x.dtype).itemsize

    G = _choose_fold(B, S, D)
    rows, cols = B * G, (S // G) * D

    x2 = x.reshape(rows, cols)                                   # contiguous: free reshape
    pe_g = pe[:S, :].astype(jnp.float32).reshape(G, cols)        # row g = seq chunk g

    budget, vmem_limit = _tpu_budgets()
    TR, TC = _choose_blocks(rows, cols, itemsize, budget)
    # Column axis OUTERMOST: the PE block index is then invariant along the
    # inner (row) axis, so Pallas never re-DMAs the same PE tile.
    grid = (pl.cdiv(cols, TC), pl.cdiv(rows, TR))

    compiler_params = pltpu.CompilerParams(
        dimension_semantics=("parallel", "parallel"),
        vmem_limit_bytes=vmem_limit,
    )
    out_shape = jax.ShapeDtypeStruct((rows, cols), x.dtype)

    x_spec = pl.BlockSpec((TR, TC), lambda c, r: (r, c))
    pe_spec = pl.BlockSpec((G, TC), lambda c, r: (0, c))
    out_spec = pl.BlockSpec((TR, TC), lambda c, r: (r, c))

    if (not training) or dropout_p <= 0.0:
        cost = pl.CostEstimate(
            flops=rows * cols,
            transcendentals=0,
            bytes_accessed=2 * rows * cols * itemsize + G * cols * 4,
        )
        grid_spec = pltpu.PrefetchScalarGridSpec(
            num_scalar_prefetch=0, grid=grid,
            in_specs=[x_spec, pe_spec], out_specs=out_spec)
        out2 = pl.pallas_call(
            functools.partial(_pe_add_kernel, tr=TR, g=G),
            out_shape=out_shape, grid_spec=grid_spec,
            compiler_params=compiler_params, cost_estimate=cost,
        )(x2, pe_g)
        return out2.reshape(B, S, D)

    # Training path: inverted dropout.  Random bits are drawn once in plain
    # JAX so the mask is tiling-independent and runs on any backend.
    # TODO(synk): on real TPU HW the in-kernel pltpu.prng_random_bits path
    # would avoid the extra 4 B/elem HBM read, but it has no CPU/interpret
    # lowering; torch's RNG stream cannot be bit-matched either way.
    threshold = min(int(round(dropout_p * 2.0 ** 32)), 2 ** 32 - 1)
    scale = 1.0 / (1.0 - dropout_p) if dropout_p < 1.0 else 0.0
    bits = jax.random.bits(jax.random.PRNGKey(seed), (rows, cols), dtype=jnp.uint32)

    bits_spec = pl.BlockSpec((TR, TC), lambda c, r: (r, c))
    cost = pl.CostEstimate(
        flops=3 * rows * cols,
        transcendentals=0,
        bytes_accessed=(2 * itemsize + 4) * rows * cols + G * cols * 4,
    )
    grid_spec = pltpu.PrefetchScalarGridSpec(
        num_scalar_prefetch=0, grid=grid,
        in_specs=[x_spec, pe_spec, bits_spec], out_specs=out_spec)
    out2 = pl.pallas_call(
        functools.partial(_pe_add_dropout_kernel, tr=TR, g=G,
                          threshold=threshold, scale=scale),
        out_shape=out_shape, grid_spec=grid_spec,
        compiler_params=compiler_params, cost_estimate=cost,
    )(x2, pe_g, bits)
    return out2.reshape(B, S, D)


# ---------------------------------------------------------------------------
# Demo / check
# ---------------------------------------------------------------------------
if __name__ == "__main__":
    B, S, D = 2, 8, 32          # batch, seq_len, d_model
    MAX_LEN = 64

    key = jax.random.PRNGKey(0)
    x = jax.random.normal(key, (B, S, D), dtype=jnp.float32)
    pe = make_positional_encoding(D, max_len=MAX_LEN)

    # eval-mode forward (dropout is identity, matches module.eval())
    out = positional_encoding_forward(x, pe, dropout_p=0.1, training=False)
    out = jax.block_until_ready(out)
    ref = x + pe[None, :S, :]
    assert out.shape == (B, S, D)
    assert jnp.allclose(out, ref, atol=1e-6, rtol=1e-6)

    # training-mode forward: every element is either 0 (dropped) or (x+pe)/(1-p)
    p = 0.1
    out_tr = positional_encoding_forward(x, pe, dropout_p=p, training=True, seed=123)
    out_tr = jax.block_until_ready(out_tr)
    scaled = ref / (1.0 - p)
    ok = jnp.all(
        (jnp.abs(out_tr) <= 1e-6)
        | (jnp.abs(out_tr - scaled) <= 1e-4 + 1e-4 * jnp.abs(scaled))
    )
    assert bool(ok)

    print("KERNEL_OK")
</pallas_src>

<mosaic_0001>
module attributes {stable_mosaic.version = 11 : i64} {
  func.func @_pe_add_kernel(%arg0: i32, %arg1: i32, %arg2: memref<4x128xf32, #tpu.memory_space<vmem>>, %arg3: memref<2x128xf32, #tpu.memory_space<vmem>>, %arg4: memref<4x128xf32, #tpu.memory_space<vmem>>) attributes {dimension_semantics = [#tpu.dimension_semantics<parallel>, #tpu.dimension_semantics<parallel>], iteration_bounds = array<i64: 1, 1>, scalar_prefetch = 0 : i64, scratch_operands = 0 : i64, tpu.core_type = #tpu.core_type<tc>, window_params = [{transform_indices = @transform_0, window_bounds = array<i64: 4, 128>}, {transform_indices = @transform_1, window_bounds = array<i64: 2, 128>}, {transform_indices = @transform_2, window_bounds = array<i64: 4, 128>}]} {
    %c0 = arith.constant 0 : index
    %c0_0 = arith.constant 0 : index
    %0 = vector.load %arg2[%c0, %c0_0] : memref<4x128xf32, #tpu.memory_space<vmem>>, vector<4x128xf32>
    %c0_1 = arith.constant 0 : index
    %c0_2 = arith.constant 0 : index
    %1 = vector.load %arg3[%c0_1, %c0_2] : memref<2x128xf32, #tpu.memory_space<vmem>>, vector<2x128xf32>
    %2 = tpu.concatenate %1, %1 in 0 : vector<2x128xf32>, vector<2x128xf32> -> vector<4x128xf32>
    %3 = arith.addf %0, %2 : vector<4x128xf32>
    %c0_3 = arith.constant 0 : index
    %c0_4 = arith.constant 0 : index
    %4 = vector.load %arg4[%c0_3, %c0_4] : memref<4x128xf32, #tpu.memory_space<vmem>>, vector<4x128xf32>
    tpu.vector_store %arg4[%c0_3, %c0_4], %3 {strides = array<i32>} : memref<4x128xf32, #tpu.memory_space<vmem>>, vector<4x128xf32>,
    return
  }
  func.func @transform_0(%arg0: i32, %arg1: i32) -> (i32, i32) {
    %c0_i32 = arith.constant 0 : i32
    return %arg1, %arg0 : i32, i32
  }
  func.func @transform_1(%arg0: i32, %arg1: i32) -> (i32, i32) {
    %c0_i32 = arith.constant 0 : i32
    %c0_i32_0 = arith.constant 0 : i32
    return %c0_i32, %arg0 : i32, i32
  }
  func.func @transform_2(%arg0: i32, %arg1: i32) -> (i32, i32) {
    %c0_i32 = arith.constant 0 : i32
    return %arg1, %arg0 : i32, i32
  }
}

</mosaic_0001>

<bundles_post_ra>
// kernel: tpu_custom_call.1
= control target key start
LH: loop header
LB: loop body
LE: loop exit
PB: predicated region body
PF: predicated region fallthrough
CT: control target
= control target key end

     0   :  { %7 = vsyncpa [#allocation3], 0  ;;  %s142_s0 = inlined_call_operand.hbm [shape: f32[4,128], index: 0, kind: input, shape index: {}]   ;;  %s143_s1 = inlined_call_operand.vmem [shape: f32[2,128], index: 1, kind: input, shape index: {}]   ;;  %s144_s2 = inlined_call_operand.hbm [shape: f32[4,128], index: 2, kind: output, shape index: {}]  }
   0x1   :  { %8 = vsyncpa [#allocation4], 0  ;;  %s98_s9 = smov [#allocation2]   ;;  %s50_s13 = scalar_lea.hbm %s142_s0, 64 }
   0x2   :  { %s15_s10 = sshll.u32 %s98_s9, 4  ;;  %p51_p0 = scmp.ne.s32.totalorder %s142_s0, %s50_s13  ;;  %s16_s10 = int_to_ptr.vmem [resolvable:$true] %s15_s10 }
   0x3   :  { %p54_p1 = scmp.lt.u32.totalorder %s50_s13, %s142_s0 }
   0x5   :  { %p56_p2 = pnand %p54_p1, %p51_p0 }
   0x7   :  { %59 = shalt.err (!%p56_p2)
}
   0x8   :  { %s60_s18 = scalar_lea.vmem %s16_s10, 64  ;;  %p65_p4 = scmp.lt.s32.totalorder %s16_s10, %s16_s10 }
   0x9   :  { %p61_p3 = scmp.ne.s32.totalorder %s16_s10, %s60_s18  ;;  %p66_p5 = scmp.lt.s32.totalorder %s60_s18, %s60_s18 }
   0xb   :  { %p67_p6 = por %p66_p5, %p65_p4 }
   0xd   :  { %p68_p7 = pnand %p67_p6, %p61_p3 }
   0xf   :  { %71 = shalt.err (!%p68_p7)
}
  0x10   :  { %18 = dma.hbm_to_vmem [thread:$0]  %s142_s0, 64, %s16_s10, [#allocation3]  }
  0x11   :  { %94 = dma.done.wait [#allocation3], 64  }
  0x12   :  { %95 = vsyncadd [#allocation3], 4294967232  ;;  %v25_v0 = vld [vmem:[%s143_s1] sm:$0x3]  ;;  %vm29_vm0 = vcmask 1041408   ;;  %s99_s23 = smov [#allocation5]  }
  0x13   :  { %v24_v1 = vld [vmem:[#allocation2] sm:$0xf]  ;;  %v27_v2 = vrot.slane %v25_v0, 6  ;;  %s39_s24 = sshll.u32 %s99_s23, 4  ;;  %s40_s24 = int_to_ptr.vmem [resolvable:$true] %s39_s24 }
  0x14   :  { %s72_s25 = scalar_lea.vmem %s40_s24, 64  ;;  %p77_p9 = scmp.lt.s32.totalorder %s40_s24, %s40_s24 }
  0x15   :  { %v30_v3 = vsel %vm29_vm0, %v25_v0, %v27_v2  ;;  %p73_p8 = scmp.ne.s32.totalorder %s40_s24, %s72_s25  ;;  %p78_p10 = scmp.lt.s32.totalorder %s72_s25, %s72_s25 }
  0x16   :  { %v31_v4 = vadd.f32 %v30_v3, %v24_v1 }
  0x17   :  { %p79_p11 = por %p78_p10, %p77_p9 }
  0x18   :  { %32 = vst [vmem:[#allocation5] sm:$0xf] %v31_v4 }
  0x19   :  { %p80_p12 = pnand %p79_p11, %p73_p8 }
  0x1b   :  { %83 = shalt.err (!%p80_p12)
}
  0x1c   :  { %s84_s1 = scalar_lea.hbm %s144_s2, 64 }
  0x1d   :  { %p85_p13 = scmp.ne.s32.totalorder %s144_s2, %s84_s1  ;;  %p88_p0 = scmp.lt.u32.totalorder %s84_s1, %s144_s2 }
  0x1f   :  { %p90_p1 = pnand %p88_p0, %p85_p13 }
  0x21   :  { %93 = shalt.err (!%p90_p1)
}
  0x22   :  { %42 = dma.vmem_to_hbm [thread:$0]  %s40_s24, 64, %s144_s2, [#allocation4]  }
  0x23   :  { %96 = dma.done.wait [#allocation4], 64  }
  0x24   :  { %97 = vsyncadd [#allocation4], 4294967232 }
  0x25   :  { %46 = vsyncpa [#allocation3], 1 }
  0x26   :  { %47 = vsyncpa [#allocation4], 1 }

</bundles_post_ra>
